<compile_context>
chip_gen: v6e
topology: v6e:2x2x1
jax: 0.10.0
libtpu: 0.0.40
codegen_flags: <defaults>
</compile_context>

<pallas_src>
import jax
import jax.numpy as jnp
import numpy as np
from jax.experimental import pallas as pl
from jax.experimental.pallas import tpu as pltpu


def _round_up(x, m):
    return (x + m - 1) // m * m


def _vmem_limit(estimate_bytes):
    # 2x headroom over the static estimate, floored at the 16 MiB default and
    # clamped to v7x's 64 MiB physical VMEM per TensorCore.
    return int(min(max(2 * estimate_bytes, 16 << 20), 64 << 20))


# ----------------------------------------------------------------------------
# Kernel 1: masked mean pool + attention pool + context fusion (per batch tile)
# ----------------------------------------------------------------------------
def pool_fuse_kernel(h_ref, am_ref, tm_ref, wa_ref, ba_ref, wf_ref, bf_ref,
                     fused_ref):
    """Grid = (batch tiles,).

    h_ref    : (Bt, S, H) bf16 last_hidden_state tile
    am_ref   : (Bt, S)    f32 attention_mask (lane-dense, 0/1)
    tm_ref   : (Bt, S)    f32 target_mask    (lane-dense, 0/1)
    wa_ref   : (1, H)     f32 attention scorer weight (row vector)
    ba_ref   : (1, 1)     f32 attention scorer bias
    wf_ref   : (2H, H)    bf16 context_fusion weight, pre-transposed (in, out)
    bf_ref   : (1, H)     f32 context_fusion bias
    fused_ref: (Bt, H)    bf16 tanh(fusion) output
    """
    Hd = h_ref.shape[2]
    am = am_ref[...]                                     # (Bt, S)
    tm = tm_ref[...]                                     # (Bt, S)

    # Cast the hidden tile to f32 once and reuse it for all three reductions.
    # TODO(synk): for large S*H, chunk this over S with lax.fori_loop to bound
    # the f32 temporary (not needed at these shapes).
    hf = h_ref[...].astype(jnp.float32)                  # (Bt, S, H)

    # Attention scores: VPU multiply + lane (H) reduce; mask; softmax over S.
    scores = jnp.sum(hf * wa_ref[...], axis=-1) + ba_ref[...]     # (Bt, S)
    scores = jnp.where(am > 0.0, scores, -10000.0)
    scores = scores - jnp.max(scores, axis=-1, keepdims=True)
    e = jnp.exp(scores)
    attn_w = e * pl.reciprocal(jnp.sum(e, axis=-1, keepdims=True), approx=True)

    # Target-token mean weights. Exact divide: counts are tiny (Bt, 1) vectors,
    # and the divisor error would scale into every element of tgt.
    tgt_w = tm / (jnp.sum(tm, axis=-1, keepdims=True) + 1e-10)    # (Bt, S)

    # Weighted sums over S (sublane reduce), reusing the single f32 copy of h.
    tgt = jnp.sum(hf * tgt_w[:, :, None], axis=1)        # (Bt, H)
    ctx = jnp.sum(hf * attn_w[:, :, None], axis=1)       # (Bt, H)

    # context_fusion: concat([tgt, ctx]) @ Wf folded into two MXU matmuls.
    fused = (jnp.dot(tgt.astype(jnp.bfloat16), wf_ref[0:Hd, :],
                     preferred_element_type=jnp.float32)
             + jnp.dot(ctx.astype(jnp.bfloat16), wf_ref[Hd:, :],
                       preferred_element_type=jnp.float32)
             + bf_ref[...])                               # (Bt, H) f32
    # Dropout(0.1): identity in eval mode.
    fused_ref[...] = jnp.tanh(fused).astype(jnp.bfloat16)


# ----------------------------------------------------------------------------
# Kernel 2: classifier matmul, all batch rows resident per column tile
#           -> w_cls streams from HBM exactly once.
# ----------------------------------------------------------------------------
def classifier_kernel(f_ref, wc_ref, bc_ref, out_ref):
    """Grid = (classifier column tiles,).

    f_ref  : (Bp, H)  bf16 fused embeddings (full batch, resident every step)
    wc_ref : (H, Ln)  bf16 classifier weight column tile
    bc_ref : (1, Ln)  f32 classifier bias tile
    out_ref: (Bp, Ln) f32 logits tile (lane-dense store)
    """
    out_ref[...] = (jnp.dot(f_ref[...], wc_ref[...],
                            preferred_element_type=jnp.float32)
                    + bc_ref[...])


def wsd_head(hidden, attention_mask, target_mask, params,
             *, block_b=64, block_l=2048):
    """Runs the WSD-head Pallas kernels. hidden: (B, S, H) float array."""
    B, S, H = hidden.shape
    L = params["w_cls"].shape[1]

    # ---- batch tiling for the pooling kernel ------------------------------
    if B <= block_b:
        Bt, Bp = B, B                               # single tile, no padding
    else:
        Bt = _round_up(min(block_b, B), 8)
        Bp = _round_up(B, Bt)
    nb = Bp // Bt

    # ---- classifier column tiling ------------------------------------------
    if L <= block_l:
        Ln, Lp = L, L                               # single column tile
    else:
        Ln = _round_up(block_l, 128)
        Lp = _round_up(L, Ln)
    nl = Lp // Ln

    # TODO(synk): in a real pipeline, cast/pad the weights once at init and
    # emit bf16 hidden straight from the backbone instead of per-call copies.
    h = hidden.astype(jnp.bfloat16)
    am = attention_mask.astype(jnp.float32)
    tm = target_mask.astype(jnp.float32)
    if Bp != B:
        h = jnp.zeros((Bp, S, H), jnp.bfloat16).at[:B].set(h)
        am = jnp.zeros((Bp, S), jnp.float32).at[:B].set(am)
        tm = jnp.zeros((Bp, S), jnp.float32).at[:B].set(tm)

    w_attn = params["w_attn"].astype(jnp.float32).reshape(1, H)
    b_attn = params["b_attn"].astype(jnp.float32).reshape(1, 1)
    w_fuse = params["w_fuse"].astype(jnp.bfloat16)
    b_fuse = params["b_fuse"].astype(jnp.float32).reshape(1, H)
    w_cls = params["w_cls"].astype(jnp.bfloat16)
    b_cls = params["b_cls"].astype(jnp.float32).reshape(1, L)
    if Lp != L:
        w_cls = jnp.zeros((H, Lp), jnp.bfloat16).at[:, :L].set(w_cls)
        b_cls = jnp.zeros((1, Lp), jnp.float32).at[:, :L].set(b_cls)

    # ---- kernel 1: pooling + fusion ----------------------------------------
    vmem1 = _vmem_limit(
        2 * Bt * S * H * 2              # double-buffered bf16 hidden tile
        + 2 * 2 * Bt * S * 4            # lane-dense masks
        + 2 * 2 * H * H * 2             # w_fuse
        + 2 * Bt * H * 2                # fused output tile
        + 3 * Bt * S * H * 4)           # f32 pooling temporaries
    fused = pl.pallas_call(
        pool_fuse_kernel,
        out_shape=jax.ShapeDtypeStruct((Bp, H), jnp.bfloat16),
        grid_spec=pltpu.PrefetchScalarGridSpec(
            num_scalar_prefetch=0,
            grid=(nb,),
            in_specs=[
                pl.BlockSpec((Bt, S, H), lambda b: (b, 0, 0)),   # hidden
                pl.BlockSpec((Bt, S), lambda b: (b, 0)),         # attention_mask
                pl.BlockSpec((Bt, S), lambda b: (b, 0)),         # target_mask
                pl.BlockSpec((1, H), lambda b: (0, 0)),          # w_attn
                pl.BlockSpec((1, 1), lambda b: (0, 0)),          # b_attn
                pl.BlockSpec((2 * H, H), lambda b: (0, 0)),      # w_fuse
                pl.BlockSpec((1, H), lambda b: (0, 0)),          # b_fuse
            ],
            out_specs=pl.BlockSpec((Bt, H), lambda b: (b, 0)),
        ),
        compiler_params=pltpu.CompilerParams(
            dimension_semantics=("parallel",),   # batch tiles are independent
            vmem_limit_bytes=vmem1),
    )(h, am, tm, w_attn, b_attn, w_fuse, b_fuse)

    # ---- kernel 2: classifier matmul (w_cls streamed exactly once) ---------
    vmem2 = _vmem_limit(
        2 * Bp * H * 2                  # fused (resident, tiny)
        + 2 * H * Ln * 2                # double-buffered w_cls column tile
        + 2 * Ln * 4                    # bias tile
        + 2 * Bp * Ln * 4)              # logits output tile
    logits = pl.pallas_call(
        classifier_kernel,
        out_shape=jax.ShapeDtypeStruct((Bp, Lp), jnp.float32),
        grid_spec=pltpu.PrefetchScalarGridSpec(
            num_scalar_prefetch=0,
            grid=(nl,),
            in_specs=[
                pl.BlockSpec((Bp, H), lambda l: (0, 0)),         # fused (all rows)
                pl.BlockSpec((H, Ln), lambda l: (0, l)),         # w_cls tile
                pl.BlockSpec((1, Ln), lambda l: (0, l)),         # b_cls tile
            ],
            out_specs=pl.BlockSpec((Bp, Ln), lambda l: (0, l)),
        ),
        compiler_params=pltpu.CompilerParams(
            dimension_semantics=("parallel",),   # column tiles are independent
            vmem_limit_bytes=vmem2),
    )(fused, w_cls, b_cls)

    return logits[:B, :L]


def ref_forward(hidden, attention_mask, target_mask, params):
    """Pure-JAX f32 reference matching the PyTorch forward semantics."""
    h = hidden.astype(jnp.float32)
    exp_mask = target_mask[..., None].astype(jnp.float32)
    tgt = (h * exp_mask).sum(axis=1) / (
        target_mask.astype(jnp.float32).sum(axis=1, keepdims=True) + 1e-10)
    scores = (h @ params["w_attn"]).squeeze(-1) + params["b_attn"][0, 0]
    scores = jnp.where(attention_mask > 0, scores, -10000.0)
    w = jax.nn.softmax(scores, axis=1)[..., None]
    ctx = (h * w).sum(axis=1)
    comb = jnp.concatenate([tgt, ctx], axis=1)
    fused = jnp.tanh(comb @ params["w_fuse"] + params["b_fuse"])
    return fused @ params["w_cls"] + params["b_cls"]


if __name__ == "__main__":
    B, S, H, L, VOCAB = 16, 16, 128, 256, 50

    key = jax.random.PRNGKey(0)
    k_emb, k_ids, k_wa, k_ba, k_wf, k_bf, k_wc, k_bc = jax.random.split(key, 8)

    # Parameters stored as (in, out), i.e. PyTorch weight.T.
    params = {
        "w_attn": jax.random.normal(k_wa, (H, 1), jnp.float32) * 0.02,
        "b_attn": jax.random.normal(k_ba, (1, 1), jnp.float32) * 0.02,
        "w_fuse": jax.random.normal(k_wf, (2 * H, H), jnp.float32) * 0.02,
        "b_fuse": jax.random.normal(k_bf, (1, H), jnp.float32) * 0.02,
        "w_cls": jax.random.normal(k_wc, (H, L), jnp.float32) * 0.02,
        "b_cls": jax.random.normal(k_bc, (1, L), jnp.float32) * 0.02,
    }

    # TODO(synk): synthetic "BERT" last_hidden_state via a deterministic
    # embedding lookup stands in for the BertModel backbone.
    input_ids = jax.random.randint(k_ids, (B, S), 0, VOCAB)
    emb_table = jax.random.normal(k_emb, (VOCAB, H), jnp.float32)
    last_hidden_state = emb_table[input_ids]                        # (B, S, H)

    # attention_mask: a couple of rows have trailing padding tokens.
    attention_mask = (jnp.ones((B, S), jnp.int32)
                      .at[1, S - 3:].set(0)
                      .at[5, S - 6:].set(0))
    # target_mask: mark the "target word" tokens (row 3 spans several tokens).
    target_mask = (jnp.zeros((B, S), jnp.float32)
                   .at[:, 2].set(1.0)
                   .at[3, 4:7].set(1.0))

    # Small tile sizes so the demo exercises both grid axes (nb=2, nl=2).
    logits = jax.block_until_ready(
        wsd_head(last_hidden_state, attention_mask, target_mask, params,
                 block_b=8, block_l=128))
    logits_ref = ref_forward(last_hidden_state, attention_mask, target_mask,
                             params)

    # bf16 weights/activations + approx softmax reciprocal => relaxed tolerance
    # vs the pure-f32 reference.
    np.testing.assert_allclose(np.asarray(logits), np.asarray(logits_ref),
                               rtol=2e-2, atol=2e-2)
    print("KERNEL_OK")
</pallas_src>

<mosaic_0001>
module attributes {stable_mosaic.version = 11 : i64} {
  func.func @pool_fuse_kernel(%arg0: i32, %arg1: memref<8x16x128xbf16, #tpu.memory_space<vmem>>, %arg2: memref<8x16xf32, #tpu.memory_space<vmem>>, %arg3: memref<8x16xf32, #tpu.memory_space<vmem>>, %arg4: memref<1x128xf32, #tpu.memory_space<vmem>>, %arg5: memref<1x1xf32, #tpu.memory_space<vmem>>, %arg6: memref<256x128xbf16, #tpu.memory_space<vmem>>, %arg7: memref<1x128xf32, #tpu.memory_space<vmem>>, %arg8: memref<8x128xbf16, #tpu.memory_space<vmem>>) attributes {dimension_semantics = [#tpu.dimension_semantics<parallel>], iteration_bounds = array<i64: 2>, scalar_prefetch = 0 : i64, scratch_operands = 0 : i64, tpu.core_type = #tpu.core_type<tc>, window_params = [{transform_indices = @transform_0, window_bounds = array<i64: 8, 16, 128>}, {transform_indices = @transform_1, window_bounds = array<i64: 8, 16>}, {transform_indices = @transform_2, window_bounds = array<i64: 8, 16>}, {pipeline_mode = #tpu.pipeline_mode<synchronous>, transform_indices = @transform_3, window_bounds = array<i64: 1, 128>}, {pipeline_mode = #tpu.pipeline_mode<synchronous>, transform_indices = @transform_4, window_bounds = array<i64: 1, 1>}, {pipeline_mode = #tpu.pipeline_mode<synchronous>, transform_indices = @transform_5, window_bounds = array<i64: 256, 128>}, {pipeline_mode = #tpu.pipeline_mode<synchronous>, transform_indices = @transform_6, window_bounds = array<i64: 1, 128>}, {transform_indices = @transform_7, window_bounds = array<i64: 8, 128>}]} {
    %c0 = arith.constant 0 : index
    %c0_0 = arith.constant 0 : index
    %0 = vector.load %arg2[%c0, %c0_0] : memref<8x16xf32, #tpu.memory_space<vmem>>, vector<8x16xf32>
    %c0_1 = arith.constant 0 : index
    %c0_2 = arith.constant 0 : index
    %1 = vector.load %arg3[%c0_1, %c0_2] : memref<8x16xf32, #tpu.memory_space<vmem>>, vector<8x16xf32>
    %c0_3 = arith.constant 0 : index
    %c0_4 = arith.constant 0 : index
    %c0_5 = arith.constant 0 : index
    %2 = vector.load %arg1[%c0_3, %c0_4, %c0_5] : memref<8x16x128xbf16, #tpu.memory_space<vmem>>, vector<8x16x128xbf16>
    %3 = arith.extf %2 : vector<8x16x128xbf16> to vector<8x16x128xf32>
    %c0_6 = arith.constant 0 : index
    %c0_7 = arith.constant 0 : index
    %4 = vector.load %arg4[%c0_6, %c0_7] : memref<1x128xf32, #tpu.memory_space<vmem>>, vector<1x128xf32>
    %5 = vector.shape_cast %4 : vector<1x128xf32> to vector<1x1x128xf32>
    %6 = vector.broadcast %5 : vector<1x1x128xf32> to vector<8x16x128xf32>
    %7 = arith.mulf %3, %6 : vector<8x16x128xf32>
    %cst = arith.constant dense<0.000000e+00> : vector<8x16xf32>
    %8 = vector.multi_reduction <add>, %7, %cst [2] : vector<8x16x128xf32> to vector<8x16xf32>
    %c0_8 = arith.constant 0 : index
    %c0_9 = arith.constant 0 : index
    %9 = vector.load %arg5[%c0_8, %c0_9] : memref<1x1xf32, #tpu.memory_space<vmem>>, vector<1x1xf32>
    %10 = vector.broadcast %9 : vector<1x1xf32> to vector<8x16xf32>
    %11 = arith.addf %8, %10 : vector<8x16xf32>
    %cst_10 = arith.constant 0.000000e+00 : f32
    %12 = vector.broadcast %cst_10 : f32 to vector<8x16xf32>
    %13 = arith.cmpf ogt, %0, %12 : vector<8x16xf32>
    %cst_11 = arith.constant -1.000000e+04 : f32
    %14 = vector.broadcast %cst_11 : f32 to vector<8x16xf32>
    %15 = arith.select %13, %11, %14 : vector<8x16xi1>, vector<8x16xf32>
    %cst_12 = arith.constant dense<0xFF800000> : vector<8xf32>
    %16 = vector.multi_reduction <maximumf>, %15, %cst_12 [1] : vector<8x16xf32> to vector<8xf32>
    %17 = vector.shape_cast %16 : vector<8xf32> to vector<8x1xf32>
    %18 = vector.broadcast %17 : vector<8x1xf32> to vector<8x16xf32>
    %19 = arith.subf %15, %18 : vector<8x16xf32>
    %20 = math.exp %19 : vector<8x16xf32>
    %cst_13 = arith.constant dense<0.000000e+00> : vector<8xf32>
    %21 = vector.multi_reduction <add>, %20, %cst_13 [1] : vector<8x16xf32> to vector<8xf32>
    %22 = vector.shape_cast %21 : vector<8xf32> to vector<8x1xf32>
    %23 = tpu.reciprocal %22 {approx = true} : vector<8x1xf32> -> vector<8x1xf32>
    %24 = vector.broadcast %23 : vector<8x1xf32> to vector<8x16xf32>
    %25 = arith.mulf %20, %24 : vector<8x16xf32>
    %cst_14 = arith.constant dense<0.000000e+00> : vector<8xf32>
    %26 = vector.multi_reduction <add>, %1, %cst_14 [1] : vector<8x16xf32> to vector<8xf32>
    %27 = vector.shape_cast %26 : vector<8xf32> to vector<8x1xf32>
    %cst_15 = arith.constant 1.000000e-10 : f32
    %28 = vector.broadcast %cst_15 : f32 to vector<8x1xf32>
    %29 = arith.addf %27, %28 : vector<8x1xf32>
    %30 = vector.broadcast %29 : vector<8x1xf32> to vector<8x16xf32>
    %31 = arith.divf %1, %30 : vector<8x16xf32>
    %32 = vector.shape_cast %31 : vector<8x16xf32> to vector<8x16x1xf32>
    %33 = vector.broadcast %32 : vector<8x16x1xf32> to vector<8x16x128xf32>
    %34 = arith.mulf %3, %33 : vector<8x16x128xf32>
    %cst_16 = arith.constant dense<0.000000e+00> : vector<8x128xf32>
    %35 = vector.multi_reduction <add>, %34, %cst_16 [1] : vector<8x16x128xf32> to vector<8x128xf32>
    %36 = vector.shape_cast %25 : vector<8x16xf32> to vector<8x16x1xf32>
    %37 = vector.broadcast %36 : vector<8x16x1xf32> to vector<8x16x128xf32>
    %38 = arith.mulf %3, %37 : vector<8x16x128xf32>
    %cst_17 = arith.constant dense<0.000000e+00> : vector<8x128xf32>
    %39 = vector.multi_reduction <add>, %38, %cst_17 [1] : vector<8x16x128xf32> to vector<8x128xf32>
    %40 = arith.truncf %35 : vector<8x128xf32> to vector<8x128xbf16>
    %c0_18 = arith.constant 0 : index
    %c0_19 = arith.constant 0 : index
    %41 = vector.load %arg6[%c0_18, %c0_19] : memref<256x128xbf16, #tpu.memory_space<vmem>>, vector<128x128xbf16>
    %cst_20 = arith.constant dense<0.000000e+00> : vector<8x128xf32>
    %42 = tpu.matmul %40, %41, %cst_20 {dimension_numbers = #tpu.dot_dimension_numbers<[1], [0], [0], [1], [0, 0, 1, 1], [], []>} : vector<8x128xbf16>, vector<128x128xbf16>, vector<8x128xf32> -> vector<8x128xf32>
    %43 = arith.truncf %39 : vector<8x128xf32> to vector<8x128xbf16>
    %c128 = arith.constant 128 : index
    %c0_21 = arith.constant 0 : index
    %44 = vector.load %arg6[%c128, %c0_21] : memref<256x128xbf16, #tpu.memory_space<vmem>>, vector<128x128xbf16>
    %cst_22 = arith.constant dense<0.000000e+00> : vector<8x128xf32>
    %45 = tpu.matmul %43, %44, %cst_22 {dimension_numbers = #tpu.dot_dimension_numbers<[1], [0], [0], [1], [0, 0, 1, 1], [], []>} : vector<8x128xbf16>, vector<128x128xbf16>, vector<8x128xf32> -> vector<8x128xf32>
    %46 = arith.addf %42, %45 : vector<8x128xf32>
    %c0_23 = arith.constant 0 : index
    %c0_24 = arith.constant 0 : index
    %47 = vector.load %arg7[%c0_23, %c0_24] : memref<1x128xf32, #tpu.memory_space<vmem>>, vector<1x128xf32>
    %48 = vector.broadcast %47 : vector<1x128xf32> to vector<8x128xf32>
    %49 = arith.addf %46, %48 : vector<8x128xf32>
    %50 = math.tanh %49 : vector<8x128xf32>
    %51 = arith.truncf %50 : vector<8x128xf32> to vector<8x128xbf16>
    %c0_25 = arith.constant 0 : index
    %c0_26 = arith.constant 0 : index
    %52 = vector.load %arg8[%c0_25, %c0_26] : memref<8x128xbf16, #tpu.memory_space<vmem>>, vector<8x128xbf16>
    tpu.vector_store %arg8[%c0_25, %c0_26], %51 {strides = array<i32>} : memref<8x128xbf16, #tpu.memory_space<vmem>>, vector<8x128xbf16>,
    return
  }
  func.func @transform_0(%arg0: i32) -> (i32, i32, i32) {
    %c0_i32 = arith.constant 0 : i32
    %c0_i32_0 = arith.constant 0 : i32
    %c0_i32_1 = arith.constant 0 : i32
    return %arg0, %c0_i32, %c0_i32_0 : i32, i32, i32
  }
  func.func @transform_1(%arg0: i32) -> (i32, i32) {
    %c0_i32 = arith.constant 0 : i32
    %c0_i32_0 = arith.constant 0 : i32
    return %arg0, %c0_i32 : i32, i32
  }
  func.func @transform_2(%arg0: i32) -> (i32, i32) {
    %c0_i32 = arith.constant 0 : i32
    %c0_i32_0 = arith.constant 0 : i32
    return %arg0, %c0_i32 : i32, i32
  }
  func.func @transform_3(%arg0: i32) -> (i32, i32) {
    %c0_i32 = arith.constant 0 : i32
    %c0_i32_0 = arith.constant 0 : i32
    %c0_i32_1 = arith.constant 0 : i32
    return %c0_i32, %c0_i32_0 : i32, i32
  }
  func.func @transform_4(%arg0: i32) -> (i32, i32) {
    %c0_i32 = arith.constant 0 : i32
    %c0_i32_0 = arith.constant 0 : i32
    %c0_i32_1 = arith.constant 0 : i32
    return %c0_i32, %c0_i32_0 : i32, i32
  }
  func.func @transform_5(%arg0: i32) -> (i32, i32) {
    %c0_i32 = arith.constant 0 : i32
    %c0_i32_0 = arith.constant 0 : i32
    %c0_i32_1 = arith.constant 0 : i32
    return %c0_i32, %c0_i32_0 : i32, i32
  }
  func.func @transform_6(%arg0: i32) -> (i32, i32) {
    %c0_i32 = arith.constant 0 : i32
    %c0_i32_0 = arith.constant 0 : i32
    %c0_i32_1 = arith.constant 0 : i32
    return %c0_i32, %c0_i32_0 : i32, i32
  }
  func.func @transform_7(%arg0: i32) -> (i32, i32) {
    %c0_i32 = arith.constant 0 : i32
    %c0_i32_0 = arith.constant 0 : i32
    return %arg0, %c0_i32 : i32, i32
  }
}

</mosaic_0001>

<bundles_post_ra>
// kernel: tpu_custom_call.1
= control target key start
LH: loop header
LB: loop body
LE: loop exit
PB: predicated region body
PF: predicated region fallthrough
CT: control target
= control target key end

     0   :  { %s2294_s0 = inlined_call_operand.hbm [shape: bf16[16,16,128], index: 0, kind: input, shape index: {}]   ;;  %s2295_s1 = inlined_call_operand.hbm [shape: f32[16,16], index: 1, kind: input, shape index: {}]   ;;  %s2296_s2 = inlined_call_operand.hbm [shape: f32[16,16], index: 2, kind: input, shape index: {}]   ;;  %s2297_s3 = inlined_call_operand.vmem [shape: f32[1,128], index: 3, kind: input, shape index: {}]   ;;  %s2298_s4 = inlined_call_operand.<no memory space> [shape: f32[1,1], index: 4, kind: input, shape index: {}]   ;;  %s2299_s5 = inlined_call_operand.hbm [shape: bf16[256,128], index: 5, kind: input, shape index: {}]   ;;  %s2300_s6 = inlined_call_operand.vmem [shape: f32[1,128], index: 6, kind: input, shape index: {}]   ;;  %s2301_s7 = inlined_call_operand.hbm [shape: bf16[16,128], index: 7, kind: output, shape index: {}]  }
   0x1   :  { %2314 = sst [smem:[#allocation22_spill]] %s2295_s1  ;;  %v12_v0 = vstv %s2298_s4 }
   0x2   :  { %13 = vst [vmem:[#allocation2] sm:$0x1] %v12_v0 }
   0x3   :  { %14 = vsyncpa [#allocation4], 0 }
   0x4   :  { %16 = vsyncpa [#allocation4 + $0x1], 0 }
   0x5   :  { %17 = vsyncpa [#allocation7], 0 }
   0x6   :  { %19 = vsyncpa [#allocation7 + $0x1], 0 }
   0x7   :  { %20 = vsyncpa [#allocation10], 0 }
   0x8   :  { %21 = vsyncpa [#allocation5], 0 }
   0x9   :  { %23 = vsyncpa [#allocation5 + $0x1], 0  ;;  %s1846_s26 = smov 0   ;;  %s1848_s27 = smov 0  }
   0xa   :  { %s1850_s28 = smov 0   ;;  %s1852_s29 = smov 0  }
   0xb LB: > { %2315 = sst [smem:[#allocation16_spill]] %s1779_s26  ;;  %s1867_s4 = sadd.s32 1, %s1791_s29   ;;  %s1791_s29 = sphi %s1852_s29, %s2341_s29   ;;  %s1787_s28 = sphi %s1850_s28, %s2343_s28   ;;  %s1783_s27 = sphi %s1848_s27, %s2345_s27   ;;  %s1779_s26 = sphi %s1846_s26, %s2344_s26  }
   0xc   : > { %2316 = sst [smem:[#allocation17_spill]] %s1787_s28  ;;  %s36_s30 = sadd.s32 1, %s1787_s28 }
   0xd   : > { %2317 = sst [smem:[#allocation18_spill]] %s1791_s29  ;;  %s33_s8 = ssub.s32 %s1791_s29, %s1867_s4 }
   0xe   : > { %2318 = sst [smem:[#allocation19_spill]] %s1867_s4  ;;  %p2302_p0 = scmp.ne.s32.totalorder %s1787_s28, %s1783_s27 }
   0xf   : > { %p34_p1 = scmp.eq.s32.totalorder %s33_s8, 0  ;;  %p44_p2 = scmp.eq.s32.totalorder %s1791_s29, 0 }
  0x10   : > { %p1543_p4 = scmp.lt.s32.totalorder %s1791_s29, 2  ;;  %s1884_s10 = sand.u32 1, %s1787_s28  }
  0x11   : > { %s1878_s9 = scalar_select %p34_p1, %s1787_s28, %s36_s30  }
  0x12   : > { %p45_p5 = por %p44_p2, %p2302_p0  ;;  %s279_s11 = sand.u32 1, %s1791_s29  }
  0x13   : > { %2319 = sst [smem:[#allocation20_spill]] %s1878_s9  ;;  %s2303_s12 = sshll.u32 %s1884_s10, 3 }
  0x14   : > { %p1888_p6 = pnand %p1543_p4, %p45_p5  ;;  %s1381_s14 = sshll.u32 %s1791_s29, 7 }
  0x15   : > { %s2321_s1 = sld [smem:[#allocation22_spill]]  ;;  %s283_s18 = scalar_lea.vmem [#allocation6], %s2303_s12 }
  0x16   : > { %s290_s19 = sshll.u32 %s283_s18, 4  ;;  %s1903_s22 = scalar_lea.hbm %s2296_s2, %s1381_s14  ;;  %s291_s19 = int_to_ptr.vmem [resolvable:$true] %s290_s19 }
  0x17   : > { %s1905_s23 = scalar_lea.sflag [#allocation7], %s279_s11  ;;  %p1911_p8 = pneg %p1888_p6 }
  0x1b   : > { %s1896_s17 = scalar_lea.hbm %s2321_s1, %s1381_s14  ;;  %s1614_s15 = scalar_lea.hbm %s2321_s1, 256 }
  0x1c   : > { %s1609_s24 = scalar_lea.hbm %s1896_s17, 128  ;;  %p1615_p11 = scmp.lt.s32.totalorder %s1896_s17, %s2321_s1 }
  0x1d   : > { %p1610_p7 = scmp.ne.s32.totalorder %s1896_s17, %s1609_s24  ;;  %p1616_p12 = scmp.lt.s32.totalorder %s1614_s15, %s1609_s24 }
  0x1f   : > { %p1612_p9 = pnand %p1911_p8, %p1610_p7  ;;  %p1617_p13 = por %p1616_p12, %p1615_p11 }
  0x21   : > { %p1613_p10 = pneg %p1612_p9 }
  0x23   : > { %p1618_p1 = pnand %p1617_p13, %p1613_p10 }
  0x25   : > { %1621 = shalt.err (!%p1618_p1)
}
  0x26   : > { %s1622_s11 = scalar_lea.vmem %s291_s19, 128  ;;  %s1793_s18 = smov [#allocation6]  }
  0x27   : > { %p1623_p2 = scmp.ne.s32.totalorder %s291_s19, %s1622_s11  ;;  %s1627_s20 = sshll.u32 %s1793_s18, 4  ;;  %s1628_s20 = int_to_ptr.vmem [resolvable:$false] %s1627_s20 }
  0x28   : > { %s1629_s21 = scalar_lea.vmem %s1628_s20, 256  ;;  %p1630_p7 = scmp.lt.s32.totalorder %s291_s19, %s1628_s20 }
  0x29   : > { %p1625_p4 = pnand %p1623_p2, %p1911_p8  ;;  %p1631_p9 = scmp.lt.s32.totalorder %s1629_s21, %s1622_s11 }
  0x2b   : > { %p1626_p5 = pneg %p1625_p4  ;;  %p1632_p3 = por %p1631_p9, %p1630_p7 }
  0x2d   : > { %p1633_p0 = pnand %p1632_p3, %p1626_p5 }
  0x2f   : > { %1636 = shalt.err (!%p1633_p0)
}
  0x30   : > { %1534 = dma.hbm_to_vmem [thread:$0]  (!%p1888_p6), %s1896_s17, 128, %s291_s19, %s1905_s23  }
  0x31   : > { %s1931_s24 = sadd.s32 4294967295, %s1791_s29   ;;  %s1372_s30 = sadd.s32 4294967294, %s1791_s29  }
  0x32   : > { %p49_p0 = scmp.ne.s32.totalorder %s1783_s27, %s1779_s26  ;;  %p2304_p3 = scmp.eq.s32.totalorder %s1931_s24, 0 }
  0x33   : > { %p209_p10 = scmp.eq.s32.totalorder %s1931_s24, 1  ;;  %p215_p11 = scmp.eq.s32.totalorder %s1372_s30, 1 }
  0x34   : > { %p1940_p12 = por %p2304_p3, %p49_p0  ;;  %p1373_p13 = scmp.ge.s32.totalorder %s1791_s29, 1 }
  0x35   : > { %p2324_p1 = scmp.ne.s32.totalorder %s1787_s28, %s1783_s27  ;;  %p1952_p4 = por %p215_p11, %p49_p0 }
  0x36   : > { %s2323_s8 = scalar_select %p1940_p12, 1, 0 }
  0x37   : > { %p1948_p2 = por %p209_p10, %p2324_p1  ;;  %p222_p5 = scmp.lt.s32.totalorder %s1791_s29, 3 }
  0x38   : > { %s2326_s19 = scalar_select %p1952_p4, 1, 0 }
  0x39   : > { %s2325_s17 = scalar_select %p1948_p2, 1, 0 }
  0x3a   : > { %2327 = sst [smem:[#allocation21_spill]] %s2326_s19  ;;  %p1957_p7 = pnand %p1373_p13, %p222_p5 }
  0x3b   : > { %s1794_s16 = smov [#allocation9]   ;;  %s1376_s11 = sshll.u32 %s1884_s10, 6 }
  0x3c   : > { %s2328_s15 = scalar_select %p1957_p7, 1, 0 }
  0x3d   : > { %s240_s14 = sshll.u32 %s1794_s16, 4  ;;  %p1524_p9 = pneg %p1957_p7  ;;  %s241_s14 = int_to_ptr.vmem [resolvable:$true] %s240_s14 }
  0x3e   : > { %s1414_s18 = sshll.u32 %s1791_s29, 10  ;;  %s261_s1 = scalar_lea.vmem [#allocation3], %s1376_s11 }
  0x3f   : > { %p1967_p10 = pnand %p1524_p9, %p2304_p3  ;;  %s1974_s12 = scalar_lea.hbm %s2294_s0, %s1414_s18 }
  0x40   : > { %s269_s9 = sshll.u32 %s261_s1, 4  ;;  %s1648_s16 = scalar_lea.vmem %s241_s14, 2048  ;;  %s1976_s9 = int_to_ptr.vmem [resolvable:$true] %s269_s9 }
  0x41   : > { %p1639_p0 = pneg %p1967_p10  ;;  %p1649_p11 = scmp.ne.s32.totalorder %s241_s14, %s1648_s16 }
  0x42   : > { %p1656_p5 = scmp.lt.s32.totalorder %s241_s14, %s241_s14  ;;  %p1657_p9 = scmp.lt.s32.totalorder %s1648_s16, %s1648_s16 }
  0x43   : > { %p1651_p13 = pnand %p1649_p11, %p1639_p0 }
  0x44   : > { %p1658_p3 = por %p1657_p9, %p1656_p5 }
  0x45   : > { %p1652_p1 = pneg %p1651_p13 }
  0x47   : > { %p1659_p4 = pnand %p1658_p3, %p1652_p1 }
  0x49   : > { %1662 = shalt.err (!%p1659_p4)
}
  0x4a   : > { %s1795_s28 = smov 64   ;;  %s1796_s1 = smov 4  }
  0x4b   : > { %1527 = dma.hbm_to_vmem [thread:$0]  (!%p1967_p10), %s2299_s5, 2048, %s241_s14, [#allocation10], %s1795_s28, %s1795_s28, %s1796_s1  }
  0x4c   : > { %s258_s21 = scalar_lea.sflag [#allocation4], %s1884_s10  ;;  %s1663_s30 = scalar_lea.hbm %s1974_s12, 1024 }
  0x4d   : > { %p1664_p3 = scmp.ne.s32.totalorder %s1974_s12, %s1663_s30  ;;  %s1668_s29 = scalar_lea.hbm %s2294_s0, 2048 }
  0x4e   : > { %p1669_p11 = scmp.lt.s32.totalorder %s1974_s12, %s2294_s0  ;;  %p1670_p13 = scmp.lt.s32.totalorder %s1668_s29, %s1663_s30 }
  0x4f   : > { %p1666_p4 = pnand %p1664_p3, %p1911_p8 }
  0x50   : > { %p1671_p1 = por %p1670_p13, %p1669_p11 }
  0x51   : > { %p1667_p0 = pneg %p1666_p4 }
  0x53   : > { %p1672_p5 = pnand %p1671_p1, %p1667_p0 }
  0x55   : > { %1675 = shalt.err (!%p1672_p5)
}
  0x56   : > { %s1676_s14 = scalar_lea.vmem %s1976_s9, 1024  ;;  %s1797_s20 = smov [#allocation3]  }
  0x57   : > { %p1677_p10 = scmp.ne.s32.totalorder %s1976_s9, %s1676_s14  ;;  %s1681_s4 = sshll.u32 %s1797_s20, 4  ;;  %s1682_s4 = int_to_ptr.vmem [resolvable:$false] %s1681_s4 }
  0x58   : > { %s1683_s11 = scalar_lea.vmem %s1682_s4, 2048  ;;  %p1684_p4 = scmp.lt.s32.totalorder %s1976_s9, %s1682_s4 }
  0x59   : > { %p1679_p9 = pnand %p1677_p10, %p1911_p8  ;;  %p1685_p2 = scmp.lt.s32.totalorder %s1683_s11, %s1676_s14 }
  0x5b   : > { %p1680_p3 = pneg %p1679_p9  ;;  %p1686_p12 = por %p1685_p2, %p1684_p4 }
  0x5d   : > { %p1687_p7 = pnand %p1686_p12, %p1680_p3 }
  0x5f   : > { %1690 = shalt.err (!%p1687_p7)
}
  0x60   : > { %1531 = dma.hbm_to_vmem [thread:$0]  (!%p1888_p6), %s1974_s12, 1024, %s1976_s9, %s258_s21, %s1795_s28, %s1795_s28, %s1796_s1  }
  0x61   : > { %s2330_s26 = sshll.u32 %s1884_s10, 3  ;;  %s1691_s18 = scalar_lea.hbm %s1903_s22, 128 }
  0x62   : > { %s301_s29 = scalar_lea.vmem [#allocation8], %s2330_s26  ;;  %p1692_p12 = scmp.ne.s32.totalorder %s1903_s22, %s1691_s18 }
  0x63   : > { %s308_s19 = sshll.u32 %s301_s29, 4  ;;  %s1696_s14 = scalar_lea.hbm %s2296_s2, 256  ;;  %s309_s19 = int_to_ptr.vmem [resolvable:$true] %s308_s19 }
  0x64   : > { %p1694_p2 = pnand %p1692_p12, %p1911_p8  ;;  %p1697_p0 = scmp.lt.s32.totalorder %s1903_s22, %s2296_s2 }
  0x65   : > { %p1698_p11 = scmp.lt.s32.totalorder %s1696_s14, %s1691_s18 }
  0x66   : > { %p1695_p7 = pneg %p1694_p2 }
  0x67   : > { %p1699_p13 = por %p1698_p11, %p1697_p0 }
  0x69   : > { %p1700_p1 = pnand %p1699_p13, %p1695_p7 }
  0x6b   : > { %1703 = shalt.err (!%p1700_p1)
}
  0x6c   : > { %s1704_s28 = scalar_lea.vmem %s309_s19, 128  ;;  %s1798_s9 = smov [#allocation8]  }
  0x6d   : > { %p1705_p5 = scmp.ne.s32.totalorder %s309_s19, %s1704_s28  ;;  %s1709_s10 = sshll.u32 %s1798_s9, 4  ;;  %s1710_s10 = int_to_ptr.vmem [resolvable:$false] %s1709_s10 }
  0x6e   : > { %s1711_s12 = scalar_lea.vmem %s1710_s10, 256  ;;  %p1712_p3 = scmp.lt.s32.totalorder %s309_s19, %s1710_s10 }
  0x6f   : > { %p1707_p10 = pnand %p1705_p5, %p1911_p8  ;;  %p1713_p4 = scmp.lt.s32.totalorder %s1711_s12, %s1704_s28 }
  0x71   : > { %p1708_p9 = pneg %p1707_p10  ;;  %p1714_p12 = por %p1713_p4, %p1712_p3 }
  0x73   : > { %p1715_p2 = pnand %p1714_p12, %p1708_p9 }
  0x75   : > { %1718 = shalt.err (!%p1715_p2)
}
  0x76   : > { %1537 = dma.hbm_to_vmem [thread:$0]  (!%p1888_p6), %s1903_s22, 128, %s309_s19, %s1905_s23  }
  0x77   : > { %p2331_p7 = scmp.ne.s32.totalorder %s2328_s15, 0 }
  0x78   : > { %s2034_s25 = sand.u32 (!%p2331_p7), 1, %s1783_s27   ;;  %p2332_p8 = scmp.ne.s32.totalorder (!%p2331_p7), %s2323_s8, 0 }
  0x79   : > { %317 = sbr.rel (%p2331_p7) target bundleno = 1079 (0x437), region = 48  ;;  %s1385_s1 = sshll.u32 (!%p2331_p7), %s2034_s25, 6 }
  0x7a   : > { %s320_s21 = scalar_lea.sflag (!%p2331_p7), [#allocation4], %s2034_s25  ;;  %s2038_s11 = scalar_lea.vmem (!%p2331_p7), [#allocation3], %s1385_s1 }
  0x7e   : > { %1762 = dma.done.wait (%p2332_p8), %s320_s21, 1024  }
  0x7f   : > { %1764 = vsyncadd (%p2332_p8), %s320_s21, 4294966272  ;;  %s328_s13 = sand.u32 1, %s1931_s24   ;;  %s1386_s22 = sshll.u32 %s2034_s25, 3 }
  0x80   : > { %s329_s23 = scalar_lea.sflag [#allocation7], %s328_s13  ;;  %s2046_s15 = scalar_lea.vmem [#allocation6], %s1386_s22 }
  0x81   : > { %1766 = dma.done.wait (%p2332_p8), %s329_s23, 256  }
  0x82   : > { %1768 = vsyncadd (%p2332_p8), %s329_s23, 4294967040  ;;  %s2052_s26 = scalar_lea.vmem [#allocation8], %s1386_s22  ;;  %p2333_p6 = scmp.eq.s32.totalorder %s1931_s24, 0 }
  0x84   : > { %1770 = dma.done.wait (%p2333_p6), [#allocation10], 2048   ;;  %p2334_p0 = pmov %p2333_p6 }
  0x85   : > { %v1799_v1 = vmov 0   ;;  %v1416_v2 = vld [vmem:[%s2038_s11] sm:$0xff]   ;;  %v1390_v3 = vld [vmem:[%s2297_s3] ss:$0 sm:$0xff]  ;;  %v1447_v4 = vld [vmem:[%s2038_s11 + $0x8] sm:$0xff]   ;;  %v520_v55 = vlaneseq  ;;  %vm531_vm0 = vcmask 130112  }
  0x86   : > { %1772 = vsyncadd (%p2334_p0), [#allocation10], 4294965248  ;;  %1584 = vset.pattern.permute.xlu0 %v1799_v1  ;;  %v2063_v5 = vunpack.c.l.bf16 %v1416_v2  ;;  %v2065_v6 = vunpack.c.h.bf16 %v1416_v2  ;;  %v2067_v7 = vunpack.c.l.bf16 %v1447_v4  ;;  %v2069_v8 = vunpack.c.h.bf16 %v1447_v4  ;;  %v1448_v9 = vld [vmem:[%s2038_s11 + $0x10] sm:$0xff]   ;;  %v1449_v12 = vld [vmem:[%s2038_s11 + $0x18] sm:$0xff]   ;;  %s1389_s30 = sshll.u32 %s2034_s25, 2  ;;  %s1410_s16 = sshll.u32 %s1931_s24, 6 }
  0x87   : > { %v2076_v14 = vunpack.c.l.bf16 %v1448_v9  ;;  %v2079_v16 = vunpack.c.h.bf16 %v1448_v9  ;;  %v1450_v17 = vld [vmem:[%s2038_s11 + $0x20] sm:$0xff]   ;;  %v2083_v19 = vunpack.c.l.bf16 %v1449_v12  ;;  %v2086_v21 = vunpack.c.h.bf16 %v1449_v12  ;;  %v1451_v26 = vld [vmem:[%s2038_s11 + $0x28] sm:$0xff]   ;;  %v1452_v31 = vld [vmem:[%s2038_s11 + $0x30] sm:$0xff]   ;;  %s385_s14 = scalar_lea.vmem [#allocation11], %s1389_s30  ;;  %s1247_s9 = scalar_lea.hbm %s2301_s7, %s1410_s16 }
  0x88   : > { %v429_v10 = vmul.f32 %v2063_v5, %v1390_v3  ;;  %v431_v11 = vmul.f32 %v2067_v7, %v1390_v3  ;;  %v430_v13 = vmul.f32 %v2065_v6, %v1390_v3  ;;  %v432_v15 = vmul.f32 %v2069_v8, %v1390_v3  ;;  %v1453_v36 = vld [vmem:[%s2038_s11 + $0x38] sm:$0xff]   ;;  %s1249_s20 = sshll.u32 %s385_s14, 4  ;;  %s1236_s10 = scalar_lea.sflag [#allocation5], %s2034_s25  ;;  %s1250_s20 = int_to_ptr.vmem [resolvable:$true] %s1249_s20 }
  0x89   : > { %v433_v18 = vmul.f32 %v2076_v14, %v1390_v3  ;;  %v434_v20 = vmul.f32 %v2079_v16, %v1390_v3  ;;  %v435_v22 = vmul.f32 %v2083_v19, %v1390_v3  ;;  %v2089_v23 = vunpack.c.l.bf16 %v1450_v17  ;;  %v1391_v43 = vld [vmem:[#allocation2] ss:$0 sm:$0xff]  ;;  %s1719_s12 = scalar_lea.vmem %s1250_s20, 64  ;;  %p2335_p13 = scmp.ne.s32.totalorder %s2325_s17, 0 }
  0x8a   : > { %445 = vadd.xlane.f32.xlu0 %v429_v10  ;;  %449 = vadd.xlane.f32.xlu1 %v431_v11  ;;  %v436_v24 = vmul.f32 %v2086_v21, %v1390_v3  ;;  %v2092_v25 = vunpack.c.h.bf16 %v1450_v17  ;;  %v2096_v28 = vunpack.c.l.bf16 %v1451_v26  ;;  %v2099_v30 = vunpack.c.h.bf16 %v1451_v26  ;;  %p1720_p11 = scmp.ne.s32.totalorder %s1250_s20, %s1719_s12  ;;  %s1802_s1 = smov [#allocation11]  }
  0x8b   : > { %v437_v27 = vmul.f32 %v2089_v23, %v1390_v3  ;;  %v2103_v33 = vunpack.c.l.bf16 %v1452_v31  ;;  %v2106_v35 = vunpack.c.h.bf16 %v1452_v31  ;;  %v2110_v38 = vunpack.c.l.bf16 %v1453_v36  ;;  %s1723_s21 = sshll.u32 %s1802_s1, 4  ;;  %s1724_s21 = int_to_ptr.vmem [resolvable:$false] %s1723_s21 }
  0x8c   : > { %v438_v29 = vmul.f32 %v2092_v25, %v1390_v3  ;;  %v439_v32 = vmul.f32 %v2096_v28, %v1390_v3  ;;  %v440_v34 = vmul.f32 %v2099_v30, %v1390_v3  ;;  %v2113_v40 = vunpack.c.h.bf16 %v1453_v36  ;;  %p1721_p1 = pnand %p1720_p11, %p2335_p13  ;;  %s1725_s24 = scalar_lea.vmem %s1724_s21, 128 }
  0x8d   : > { %v441_v37 = vmul.f32 %v2103_v33, %v1390_v3  ;;  %v442_v39 = vmul.f32 %v2106_v35, %v1390_v3  ;;  %v443_v41 = vmul.f32 %v2110_v38, %v1390_v3  ;;  %v521_v58 = vand.u32 127, %v520_v55  ;;  %p1726_p10 = scmp.lt.s32.totalorder %s1250_s20, %s1724_s21  ;;  %p1727_p9 = scmp.lt.s32.totalorder %s1725_s24, %s1719_s12 }
  0x8e   : > { %447 = vadd.xlane.f32.xlu0 %v430_v13  ;;  %451 = vadd.xlane.f32.xlu1 %v432_v15  ;;  %v444_v42 = vmul.f32 %v2113_v40, %v1390_v3  ;;  %v2117_v60 = vshrl.u32 %v520_v55, 7  ;;  %vm596_vm1 = vcmask 1041409   ;;  %vm598_vm2 = vcmask 1042434   ;;  %p1722_p5 = pneg %p1721_p1 }
  0x8f   : > { %v526_v61 = vadd.s32 4294967288, %v521_v58  ;;  %vm600_vm3 = vcmask 1043459   ;;  %vm602_vm4 = vcmask 1044484   ;;  %vm604_vm5 = vcmask 1045509   ;;  %p1728_p3 = por %p1727_p9, %p1726_p10 }
  0x90   : > { %v524_v0 = vsub.s32 %v521_v58, %v2117_v60  ;;  %vm606_vm6 = vcmask 1046534   ;;  %vm608_vm7 = vcmask 1047559   ;;  %vm612_vm9 = vcmask 130048  }
  0x91   : > { %v529_v1 = vsub.s32 %v526_v61, %v2117_v60  ;;  %vm1801_vm10 = vmmov 0   ;;  %p1729_p4 = pnand %p1728_p3, %p1722_p5 }
  0x92   : > { %453 = vadd.xlane.f32.xlu0 %v433_v18  ;;  %455 = vadd.xlane.f32.xlu1 %v434_v20 }
  0x96   : > { %457 = vadd.xlane.f32.xlu0 %v435_v22  ;;  %459 = vadd.xlane.f32.xlu1 %v436_v24 }
  0x9a   : > { %461 = vadd.xlane.f32.xlu0 %v437_v27  ;;  %463 = vadd.xlane.f32.xlu1 %v438_v29 }
  0x9e   : > { %465 = vadd.xlane.f32.xlu0 %v439_v32  ;;  %467 = vadd.xlane.f32.xlu1 %v440_v34 }
  0xa2   : > { %469 = vadd.xlane.f32.xlu0 %v441_v37  ;;  %471 = vadd.xlane.f32.xlu1 %v442_v39 }
  0xa6   : > { %473 = vadd.xlane.f32.xlu0 %v443_v41  ;;  %475 = vadd.xlane.f32.xlu1 %v444_v42 }
  0xbc   : > { %484 = vperm.xlu0 %1584, %v1391_v43  }
 0x113   : > { %v446_v44 = vpop.xlane.xlu0 %445  ;;  %v450_v45 = vpop.xlane.xlu1 %449 }
 0x117   : > { %v448_v46 = vpop.xlane.xlu0 %447  ;;  %v452_v47 = vpop.xlane.xlu1 %451 }
 0x11b   : > { %v454_v48 = vpop.xlane.xlu0 %453  ;;  %v456_v49 = vpop.xlane.xlu1 %455 }
 0x11f   : > { %v458_v50 = vpop.xlane.xlu0 %457  ;;  %v460_v51 = vpop.xlane.xlu1 %459 }
 0x123   : > { %v462_v52 = vpop.xlane.xlu0 %461  ;;  %v464_v54 = vpop.xlane.xlu1 %463 }
 0x127   : > { %v466_v53 = vpop.xlane.xlu0 %465  ;;  %v468_v57 = vpop.xlane.xlu1 %467 }
 0x12b   : > { %v470_v56 = vpop.xlane.xlu0 %469  ;;  %v472_v62 = vpop.xlane.xlu1 %471 }
 0x12f   : > { %v474_v59 = vpop.xlane.xlu0 %473  ;;  %v476_v12 = vpop.xlane.xlu1 %475 }
 0x137   : > { %v485_v63 = vpop.permute.xlu0 %484 }
 0x138   : > { %v487_v2 = vadd.f32 %v485_v63, %v446_v44  ;;  %v488_v3 = vadd.f32 %v485_v63, %v448_v46  ;;  %v489_v4 = vadd.f32 %v485_v63, %v450_v45  ;;  %v490_v9 = vadd.f32 %v485_v63, %v452_v47 }
 0x139   : > { %v491_v10 = vadd.f32 %v485_v63, %v454_v48  ;;  %v492_v11 = vadd.f32 %v485_v63, %v456_v49  ;;  %v493_v13 = vadd.f32 %v485_v63, %v458_v50  ;;  %v494_v15 = vadd.f32 %v485_v63, %v460_v51 }
 0x13a   : > { %v495_v17 = vadd.f32 %v485_v63, %v462_v52  ;;  %v496_v18 = vadd.f32 %v485_v63, %v464_v54  ;;  %v497_v20 = vadd.f32 %v485_v63, %v466_v53  ;;  %v498_v22 = vadd.f32 %v485_v63, %v468_v57  ;;  %v388_v53 = vld [vmem:[%s2046_s15] sm:$0xff] }
 0x13b   : > { %v499_v24 = vadd.f32 %v485_v63, %v470_v56  ;;  %v500_v26 = vadd.f32 %v485_v63, %v472_v62  ;;  %v525_v27 = vrot.slane %v487_v2, %v524_v0  ;;  %v530_v29 = vrot.slane %v488_v3, %v529_v1 }
 0x13c   : > { %v536_v31 = vrot.slane %v489_v4, %v524_v0  ;;  %v540_v32 = vrot.slane %v490_v9, %v529_v1  ;;  %v501_v34 = vadd.f32 %v485_v63, %v474_v59  ;;  %v502_v36 = vadd.f32 %v485_v63, %v476_v12  ;;  %v389_v9 = vld [vmem:[%s2052_s26] sm:$0xff] }
 0x13d   : > { %v545_v37 = vrot.slane %v491_v10, %v524_v0  ;;  %v549_v39 = vrot.slane %v492_v11, %v529_v1  ;;  %v532_v41 = vsel %vm531_vm0, %v530_v29, %v525_v27  ;;  %v554_v43 = vrot.slane %v493_v13, %v524_v0 }
 0x13e   : > { %v541_v42 = vsel %vm531_vm0, %v540_v32, %v536_v31  ;;  %v558_v44 = vrot.slane %v494_v15, %v529_v1  ;;  %v563_v46 = vrot.slane %v495_v17, %v524_v0  ;;  %v567_v47 = vrot.slane %v496_v18, %v529_v1 }
 0x13f   : > { %v550_v45 = vsel %vm531_vm0, %v549_v39, %v545_v37  ;;  %v572_v48 = vrot.slane %v497_v20, %v524_v0  ;;  %v576_v49 = vrot.slane %v498_v22, %v529_v1  ;;  %v581_v50 = vrot.slane %v499_v24, %v524_v0 }
 0x140   : > { %v585_v51 = vrot.slane %v500_v26, %v529_v1  ;;  %v597_v52 = vsel %vm596_vm1, %v541_v42, %v532_v41  ;;  %v559_v54 = vsel %vm531_vm0, %v558_v44, %v554_v43  ;;  %v590_v55 = vrot.slane %v501_v34, %v524_v0 }
 0x141   : > { %v594_v56 = vrot.slane %v502_v36, %v529_v1  ;;  %v599_v57 = vsel %vm598_vm2, %v550_v45, %v597_v52  ;;  %v568_v58 = vsel %vm531_vm0, %v567_v47, %v563_v46  ;;  %v577_v61 = vsel %vm531_vm0, %v576_v49, %v572_v48  ;;  %v1585_v49 = vld [vmem:[#allocation9 + $0x38] sm:$0xff]   ;;  %v1587_v52 = vld [vmem:[#allocation9 + $0x28] sm:$0xff]  }
 0x142   : > { %v601_v59 = vsel %vm600_vm3, %v559_v54, %v599_v57  ;;  %vm503_vm8 = vcmp.gt.f32.partialorder %v388_v53, 0.0  ;;  %v586_v63 = vsel %vm531_vm0, %v585_v51, %v581_v50  ;;  %v624_v11 = vsel %vm612_vm9, %v389_v9, 0.0  ;;  %v1586_v51 = vld [vmem:[#allocation9 + $0x30] sm:$0xff]   ;;  %v1588_v53 = vld [vmem:[#allocation9 + $0x20] sm:$0xff]   ;;  %v1589_v54 = vld [vmem:[#allocation9 + $0x18] sm:$0xff]  }
 0x143   : > { %v603_v62 = vsel %vm602_vm4, %v568_v58, %v601_v59  ;;  %v595_v0 = vsel %vm531_vm0, %v594_v56, %v590_v55  ;;  %v654_v17 = vsub.s32 2, %v2117_v60  ;;  %v632_v18 = vsub.s32 0, %v2117_v60  ;;  %v1590_v55 = vld [vmem:[#allocation9 + $0x10] sm:$0xff]   ;;  %v1591_v56 = vld [vmem:[#allocation9 + $0x8] sm:$0xff]   ;;  %v1592_v57 = vld [vmem:[#allocation9] sm:$0xff]  }
 0x144   : > { %v605_v2 = vsel %vm604_vm5, %v577_v61, %v603_v62  ;;  %v665_v27 = vsub.s32 3, %v2117_v60  ;;  %v676_v31 = vsub.s32 4, %v2117_v60  ;;  %v687_v34 = vsub.s32 5, %v2117_v60 }
 0x145   : > { %v607_v1 = vsel %vm606_vm6, %v586_v63, %v605_v2  ;;  %v698_v37 = vsub.s32 6, %v2117_v60  ;;  %v709_v41 = vsub.s32 7, %v2117_v60  ;;  %v643_v47 = vsub.s32 1, %v2117_v60 }
 0x146   : > { %v609_v3 = vsel %vm608_vm7, %v595_v0, %v607_v1  ;;  %v1800_v50 = vmov 0.0  }
 0x147   : > { %v611_v4 = vsel %vm503_vm8, %v609_v3, -10000.0  ;;  %1492 = vmatprep.subr.bf16.mxu1 %v1800_v50  ;;  %1472 = vmatprep.subr.bf16.mxu0 %v1800_v50 }
 0x148   : > { %v613_v10 = vsel %vm612_vm9, %v611_v4, -inf  ;;  %1493 = vmatpush3.bf16.msra.mxu1 %v1585_v49  ;;  %1508 = vmatprep.mubr.msk.bf16.mxu1 %vm1801_vm10, %v1800_v50 }
 0x149   : > { %614 = vmax.xlane.f32.xlu1 %v613_v10  ;;  %1494 = vmatprep.subr.bf16.mxu1 %v1800_v50 }
 0x14a   : > { %1488 = vmatprep.mubr.msk.bf16.mxu0 %vm1801_vm10, %v1800_v50 }
 0x14c   : > { %1495 = vmatpush3.bf16.msra.mxu1 %v1586_v51 }
 0x14d   : > { %625 = vadd.xlane.f32.xlu1 %v624_v11  ;;  %1496 = vmatprep.subr.bf16.mxu1 %v1800_v50 }
 0x150   : > { %1497 = vmatpush3.bf16.msra.mxu1 %v1587_v52 }
 0x151   : > { %1498 = vmatprep.subr.bf16.mxu1 %v1800_v50 }
 0x154   : > { %1499 = vmatpush3.bf16.msra.mxu1 %v1588_v53 }
 0x155   : > { %1500 = vmatprep.subr.bf16.mxu1 %v1800_v50 }
 0x158   : > { %1501 = vmatpush3.bf16.msra.mxu1 %v1589_v54 }
 0x159   : > { %1502 = vmatprep.subr.bf16.mxu1 %v1800_v50 }
 0x15c   : > { %1503 = vmatpush3.bf16.msra.mxu1 %v1590_v55 }
 0x15d   : > { %1504 = vmatprep.subr.bf16.mxu1 %v1800_v50 }
 0x160   : > { %1505 = vmatpush3.bf16.msra.mxu1 %v1591_v56 }
 0x161   : > { %1506 = vmatprep.subr.bf16.mxu1 %v1800_v50 }
 0x164   : > { %1507 = vmatpush3.bf16.msra.mxu1 %v1592_v57 }
 0x1d2   : > { %v615_v12 = vpop.xlane.xlu1 %614 }
 0x1d3   : > { %v616_v42 = vsub.f32 %v611_v4, %v615_v12 }
 0x1d5   : > { %v617_v44 = vmul.f32 1.442695, %v616_v42 }
 0x1d6   : > { %v626_v13 = vpop.xlane.xlu1 %625 }
 0x1d7   : > { %v627_v15 = vadd.f32 1e-10, %v626_v13 }
 0x1d9   : > { %1601 = vrcp.f32 %v627_v15 }
 0x1da   : > { %1603 = vpow2.f32 %v617_v44 }
 0x1e6   : > { %v1602_v20 = vpop.eup %1601 }
 0x1e7   : > { %v629_v22 = vmul.f32 %v1602_v20, %v389_v9  ;;  %v1604_v45 = vpop.eup %1603 }
 0x1e8   : > { %v619_v46 = vsel %vm612_vm9, %v1604_v45, 0.0 }
 0x1e9   : > { %v655_v24 = vrot.slane %v629_v22, %v654_v17  ;;  %v633_v26 = vrot.slane %v629_v22, %v632_v18  ;;  %v666_v29 = vrot.slane %v629_v22, %v665_v27  ;;  %v677_v32 = vrot.slane %v629_v22, %v676_v31 }
 0x1ea   : > { %v688_v36 = vrot.slane %v629_v22, %v687_v34  ;;  %v699_v39 = vrot.slane %v629_v22, %v698_v37  ;;  %v710_v43 = vrot.slane %v629_v22, %v709_v41  ;;  %v644_v48 = vrot.slane %v629_v22, %v643_v47 }
 0x1eb   : > { %661 = vbcast.lane.b32.xlu0 %v655_v24, 264  ;;  %635 = vbcast.lane.b32.xlu1 %v633_v26, 256 }
 0x1ef   : > { %672 = vbcast.lane.b32.xlu0 %v666_v29, 264  ;;  %639 = vbcast.lane.b32.xlu1 %v633_v26, 264 }
 0x1f3   : > { %683 = vbcast.lane.b32.xlu0 %v677_v32, 264 }
 0x1f7   : > { %694 = vbcast.lane.b32.xlu0 %v688_v36, 264 }
 0x1fb   : > { %705 = vbcast.lane.b32.xlu0 %v699_v39, 264 }
 0x1ff   : > { %716 = vbcast.lane.b32.xlu0 %v710_v43, 264 }
 0x213   : > { %620 = vadd.xlane.f32.xlu1 %v619_v46 }
 0x224   : > { %646 = vbcast.lane.b32.xlu1 %v644_v48, 256 }
 0x228   : > { %650 = vbcast.lane.b32.xlu1 %v644_v48, 264 }
 0x22c   : > { %657 = vbcast.lane.b32.xlu1 %v655_v24, 256 }
 0x230   : > { %668 = vbcast.lane.b32.xlu1 %v666_v29, 256 }
 0x234   : > { %679 = vbcast.lane.b32.xlu1 %v677_v32, 256 }
 0x238   : > { %690 = vbcast.lane.b32.xlu1 %v688_v36, 256 }
 0x23c   : > { %701 = vbcast.lane.b32.xlu1 %v699_v39, 256 }
 0x240   : > { %712 = vbcast.lane.b32.xlu1 %v710_v43, 256 }
 0x25d   : > { %v636_v58 = vpop.permute.xlu1 %635  ;;  %v662_v61 = vpop.permute.xlu0 %661 }
 0x25e   : > { %v718_v9 = vmul.f32 %v2063_v5, %v636_v58  ;;  %v723_v15 = vmul.f32 %v2079_v16, %v662_v61 }
 0x261   : > { %v640_v59 = vpop.permute.xlu1 %639  ;;  %v673_v2 = vpop.permute.xlu0 %672 }
 0x262   : > { %v719_v0 = vmul.f32 %v2065_v6, %v640_v59  ;;  %v725_v39 = vmul.f32 %v2086_v21, %v673_v2 }
 0x264   : > { %v734_v11 = vadd.f32 %v719_v0, %v718_v9 }
 0x265   : > { %v684_v12 = vpop.permute.xlu0 %683 }
 0x266   : > { %v735_v32 = vrot.slane %v734_v11, 4  ;;  %v727_v53 = vmul.f32 %v2092_v25, %v684_v12 }
 0x269   : > { %v695_v46 = vpop.permute.xlu0 %694 }
 0x26d   : > { %v706_v61 = vpop.permute.xlu0 %705 }
 0x29c   : > { %v621_v62 = vpop.xlane.xlu1 %620 }
 0x29d   : > { %1605 = vrcp.f32 %v621_v62 }
 0x2a0   : > { %v647_v63 = vpop.permute.xlu1 %646 }
 0x2a1   : > { %v720_v3 = vmul.f32 %v2067_v7, %v647_v63 }
 0x2a4   : > { %v651_v1 = vpop.permute.xlu1 %650 }
 0x2a5   : > { %v721_v4 = vmul.f32 %v2069_v8, %v651_v1 }
 0x2a7   : > { %v741_v10 = vadd.f32 %v721_v4, %v720_v3  ;;  %v729_v3 = vmul.f32 %v2099_v30, %v695_v46 }
 0x2a8   : > { %v658_v13 = vpop.permute.xlu1 %657 }
 0x2a9   : > { %v722_v20 = vmul.f32 %v2076_v14, %v658_v13  ;;  %v742_v26 = vrot.slane %v741_v10, 4 }
 0x2aa   : > { %v1606_v22 = vpop.eup %1605 }
 0x2ab   : > { %v2182_v24 = vmul.f32 %v1606_v22, %v1604_v45  ;;  %v748_v29 = vadd.f32 %v723_v15, %v722_v20  ;;  %v743_v48 = vadd.f32 %v742_v26, %v741_v10  ;;  %v736_v45 = vadd.f32 %v735_v32, %v734_v11  ;;  %v1593_v10 = vld [vmem:[#allocation9 + $0x78] sm:$0xff]  }
 0x2ac   : > { %v669_v36 = vpop.permute.xlu1 %668  ;;  %1473 = vmatpush3.bf16.msra.mxu0 %v1593_v10  ;;  %v1596_v10 = vld [vmem:[#allocation9 + $0x60] sm:$0xff]  }
 0x2ad   : > { %v749_v42 = vrot.slane %v748_v29, 4  ;;  %v724_v43 = vmul.f32 %v2083_v19, %v669_v36  ;;  %v793_v44 = vrot.slane %v2182_v24, %v632_v18  ;;  %v804_v56 = vrot.slane %v2182_v24, %v643_v47  ;;  %1474 = vmatprep.subr.bf16.mxu0 %v1800_v50 }
 0x2ae   : > { %v744_v57 = vrot.slane %v743_v48, 2  ;;  %v737_v59 = vrot.slane %v736_v45, 2  ;;  %v815_v1 = vrot.slane %v2182_v24, %v654_v17  ;;  %v826_v26 = vrot.slane %v2182_v24, %v665_v27 }
 0x2af   : > { %v755_v49 = vadd.f32 %v725_v39, %v724_v43  ;;  %799 = vbcast.lane.b32.xlu0 %v793_v44, 264  ;;  %795 = vbcast.lane.b32.xlu1 %v793_v44, 256  ;;  %v750_v51 = vadd.f32 %v749_v42, %v748_v29  ;;  %v731_v17 = vmul.f32 %v2106_v35, %v706_v61  ;;  %v717_v29 = vpop.permute.xlu0 %716  ;;  %v1594_v43 = vld [vmem:[#allocation9 + $0x70] sm:$0xff]  }
 0x2b0   : > { %v680_v52 = vpop.permute.xlu1 %679  ;;  %v745_v47 = vadd.f32 %v744_v57, %v743_v48  ;;  %v738_v11 = vadd.f32 %v737_v59, %v736_v45  ;;  %v733_v27 = vmul.f32 %v2113_v40, %v717_v29  ;;  %1475 = vmatpush3.bf16.msra.mxu0 %v1594_v43 }
 0x2b1   : > { %v756_v54 = vrot.slane %v755_v49, 4  ;;  %v726_v55 = vmul.f32 %v2089_v23, %v680_v52  ;;  %v751_v62 = vrot.slane %v750_v51, 2  ;;  %1476 = vmatprep.subr.bf16.mxu0 %v1800_v50 }
 0x2b2   : > { %v746_v39 = vrot.slane %v745_v47, 1  ;;  %v739_v44 = vrot.slane %v738_v11, 1 }
 0x2b3   : > { %v757_v58 = vadd.f32 %v756_v54, %v755_v49  ;;  %v762_v18 = vadd.f32 %v727_v53, %v726_v55  ;;  %810 = vbcast.lane.b32.xlu0 %v804_v56, 264  ;;  %806 = vbcast.lane.b32.xlu1 %v804_v56, 256  ;;  %v752_v12 = vadd.f32 %v751_v62, %v750_v51 }
 0x2b4   : > { %v691_v63 = vpop.permute.xlu1 %690  ;;  %v837_v53 = vrot.slane %v2182_v24, %v676_v31  ;;  %v747_v57 = vadd.f32 %v746_v39, %v745_v47  ;;  %v848_v31 = vrot.slane %v2182_v24, %v687_v34  ;;  %v859_v34 = vrot.slane %v2182_v24, %v698_v37  ;;  %v1597_v39 = vld [vmem:[#allocation9 + $0x58] sm:$0xff]  }
 0x2b5   : > { %v758_v2 = vrot.slane %v757_v58, 2  ;;  %v763_v0 = vrot.slane %v762_v18, 4  ;;  %v728_v4 = vmul.f32 %v2096_v28, %v691_v63  ;;  %v753_v46 = vrot.slane %v752_v12, 1 }
 0x2b6   : > { %v740_v63 = vadd.f32 %v739_v44, %v738_v11  ;;  %v951_v47 = vpack.c.bf16 %v747_v57, %v747_v57  ;;  %v870_v37 = vrot.slane %v2182_v24, %v709_v41 }
 0x2b7   : > { %v764_v9 = vadd.f32 %v763_v0, %v762_v18  ;;  %821 = vbcast.lane.b32.xlu0 %v815_v1, 264  ;;  %v769_v13 = vadd.f32 %v729_v3, %v728_v4  ;;  %817 = vbcast.lane.b32.xlu1 %v815_v1, 256  ;;  %v759_v20 = vadd.f32 %v758_v2, %v757_v58  ;;  %v1595_v18 = vld [vmem:[#allocation9 + $0x68] sm:$0xff]  }
 0x2b8   : > { %v702_v15 = vpop.permute.xlu1 %701  ;;  %v754_v59 = vadd.f32 %v753_v46, %v752_v12  ;;  %1477 = vmatpush3.bf16.msra.mxu0 %v1595_v18  ;;  %v950_v11 = vpack.c.bf16 %v740_v63, %v740_v63  ;;  %v1120_v29 = vunpack.c.l.b16 %v951_v47 }
 0x2b9   : > { %v765_v22 = vrot.slane %v764_v9, 2  ;;  %v770_v32 = vrot.slane %v769_v13, 4  ;;  %v730_v36 = vmul.f32 %v2103_v33, %v702_v15  ;;  %v760_v51 = vrot.slane %v759_v20, 1  ;;  %1478 = vmatprep.subr.bf16.mxu0 %v1800_v50 }
 0x2ba   : > { %v952_v12 = vpack.c.bf16 %v754_v59, %v754_v59  ;;  %v1119_v44 = vunpack.c.l.b16 %v950_v11 }
 0x2bb   : > { %v766_v42 = vadd.f32 %v765_v22, %v764_v9  ;;  %832 = vbcast.lane.b32.xlu0 %v826_v26, 264  ;;  %v771_v48 = vadd.f32 %v770_v32, %v769_v13  ;;  %v776_v49 = vadd.f32 %v731_v17, %v730_v36  ;;  %828 = vbcast.lane.b32.xlu1 %v826_v26, 256 }
 0x2bc   : > { %v713_v45 = vpop.permute.xlu1 %712  ;;  %v761_v2 = vadd.f32 %v760_v51, %v759_v20  ;;  %1479 = vmatpush3.bf16.msra.mxu0 %v1596_v10 }
 0x2bd   : > { %v732_v52 = vmul.f32 %v2110_v38, %v713_v45  ;;  %v767_v54 = vrot.slane %v766_v42, 1  ;;  %v772_v55 = vrot.slane %v771_v48, 2  ;;  %v777_v56 = vrot.slane %v776_v49, 4  ;;  %1480 = vmatprep.subr.bf16.mxu0 %v1800_v50 }
 0x2be   : > { %v953_v20 = vpack.c.bf16 %v761_v2, %v761_v2 }
 0x2bf   : > { %v783_v58 = vadd.f32 %v733_v27, %v732_v52  ;;  %843 = vbcast.lane.b32.xlu0 %v837_v53, 264  ;;  %v773_v61 = vadd.f32 %v772_v55, %v771_v48  ;;  %v778_v62 = vadd.f32 %v777_v56, %v776_v49  ;;  %839 = vbcast.lane.b32.xlu1 %v837_v53, 256  ;;  %v1598_v53 = vld [vmem:[#allocation9 + $0x50] sm:$0xff]  }
 0x2c0   : > { %v768_v1 = vadd.f32 %v767_v54, %v766_v42  ;;  %v1121_v42 = vunpack.c.l.b16 %v952_v12  ;;  %v1122_v46 = vunpack.c.l.b16 %v953_v20  ;;  %1481 = vmatpush3.bf16.msra.mxu0 %v1597_v39  ;;  %v1127_v27 = vsel %vm596_vm1, %v1120_v29, %v1119_v44 }
 0x2c1   : > { %v784_v0 = vrot.slane %v783_v58, 4  ;;  %v774_v3 = vrot.slane %v773_v61, 1  ;;  %v779_v4 = vrot.slane %v778_v62, 2  ;;  %1482 = vmatprep.subr.bf16.mxu0 %v1800_v50 }
 0x2c2   : > { %v954_v26 = vpack.c.bf16 %v768_v1, %v768_v1  ;;  %v1128_v54 = vsel %vm598_vm2, %v1121_v42, %v1127_v27 }
 0x2c3   : > { %v785_v9 = vadd.f32 %v784_v0, %v783_v58  ;;  %854 = vbcast.lane.b32.xlu0 %v848_v31, 264  ;;  %v775_v13 = vadd.f32 %v774_v3, %v773_v61  ;;  %v780_v15 = vadd.f32 %v779_v4, %v778_v62  ;;  %850 = vbcast.lane.b32.xlu1 %v848_v31, 256  ;;  %v1599_v58 = vld [vmem:[#allocation9 + $0x48] sm:$0xff]   ;;  %v1600_v61 = vld [vmem:[#allocation9 + $0x40] sm:$0xff]  }
 0x2c4   : > { %v1123_v49 = vunpack.c.l.b16 %v954_v26  ;;  %v1129_v60 = vsel %vm600_vm3, %v1122_v46, %v1128_v54  ;;  %1483 = vmatpush3.bf16.msra.mxu0 %v1598_v53 }
 0x2c5   : > { %v786_v22 = vrot.slane %v785_v9, 2  ;;  %v781_v17 = vrot.slane %v780_v15, 1  ;;  %v955_v32 = vpack.c.bf16 %v775_v13, %v775_v13  ;;  %1484 = vmatprep.subr.bf16.mxu0 %v1800_v50 }
 0x2c6   : > { %v1130_v41 = vsel %vm602_vm4, %v1123_v49, %v1129_v60 }
 0x2c7   : > { %v787_v36 = vadd.f32 %v786_v22, %v785_v9  ;;  %865 = vbcast.lane.b32.xlu0 %v859_v34, 264  ;;  %v782_v43 = vadd.f32 %v781_v17, %v780_v15  ;;  %861 = vbcast.lane.b32.xlu1 %v859_v34, 256  ;;  %v1124_v51 = vunpack.c.l.b16 %v955_v32 }
 0x2c8   : > { %1485 = vmatpush3.bf16.msra.mxu0 %v1599_v58 }
 0x2c9   : > { %v788_v48 = vrot.slane %v787_v36, 1  ;;  %v956_v45 = vpack.c.bf16 %v782_v43, %v782_v43  ;;  %v1131_v57 = vsel %vm604_vm5, %v1124_v51, %v1130_v41  ;;  %1486 = vmatprep.subr.bf16.mxu0 %v1800_v50 }
 0x2cb   : > { %v789_v52 = vadd.f32 %v788_v48, %v787_v36  ;;  %876 = vbcast.lane.b32.xlu0 %v870_v37, 264  ;;  %v1125_v55 = vunpack.c.l.b16 %v956_v45  ;;  %872 = vbcast.lane.b32.xlu1 %v870_v37, 256 }
 0x2cc   : > { %1487 = vmatpush3.bf16.msra.mxu0 %v1600_v61 }
 0x2cd   : > { %v957_v56 = vpack.c.bf16 %v789_v52, %v789_v52  ;;  %v1132_v18 = vsel %vm606_vm6, %v1125_v55, %v1131_v57 }
 0x2cf   : > { %v1126_v24 = vunpack.c.l.b16 %v957_v56 }
 0x2d1   : > { %v1133_v59 = vsel %vm608_vm7, %v1126_v24, %v1132_v18 }
 0x2d2   : > { %v1134_v62 = vpack.c.b16 %v1133_v59, %v1133_v59 }
 0x2d4   : > { %1509 = vmatmul.mubr.bf16.vlgmr.msra.gmra.mxu1 %v1134_v62 }
 0x321   : > { %v800_v63 = vpop.permute.xlu0 %799  ;;  %v796_v2 = vpop.permute.xlu1 %795 }
 0x322   : > { %v879_v3 = vmul.f32 %v2065_v6, %v800_v63  ;;  %v878_v4 = vmul.f32 %v2063_v5, %v796_v2 }
 0x324   : > { %v894_v50 = vadd.f32 %v879_v3, %v878_v4 }
 0x325   : > { %v811_v0 = vpop.permute.xlu0 %810  ;;  %v807_v1 = vpop.permute.xlu1 %806 }
 0x326   : > { %v881_v31 = vmul.f32 %v2069_v8, %v811_v0  ;;  %v880_v47 = vmul.f32 %v2067_v7, %v807_v1  ;;  %v895_v26 = vrot.slane %v894_v50, 4 }
 0x328   : > { %v901_v9 = vadd.f32 %v881_v31, %v880_v47  ;;  %v896_v39 = vadd.f32 %v895_v26, %v894_v50 }
 0x329   : > { %v822_v10 = vpop.permute.xlu0 %821  ;;  %v818_v13 = vpop.permute.xlu1 %817 }
 0x32a   : > { %v883_v12 = vmul.f32 %v2079_v16, %v822_v10  ;;  %v882_v15 = vmul.f32 %v2076_v14, %v818_v13  ;;  %v902_v11 = vrot.slane %v901_v9, 4 }
 0x32c   : > { %v908_v20 = vadd.f32 %v883_v12, %v882_v15  ;;  %v903_v17 = vadd.f32 %v902_v11, %v901_v9 }
 0x32d   : > { %v833_v22 = vpop.permute.xlu0 %832  ;;  %v829_v34 = vpop.permute.xlu1 %828 }
 0x32e   : > { %v885_v8 = vmul.f32 %v2086_v21, %v833_v22  ;;  %v909_v6 = vrot.slane %v908_v20, 4  ;;  %v884_v5 = vmul.f32 %v2083_v19, %v829_v34  ;;  %v904_v43 = vrot.slane %v903_v17, 2 }
 0x32f   : > { %v897_v19 = vrot.slane %v896_v39, 2 }
 0x330   : > { %v915_v7 = vadd.f32 %v885_v8, %v884_v5  ;;  %v910_v32 = vadd.f32 %v909_v6, %v908_v20  ;;  %v905_v52 = vadd.f32 %v904_v43, %v903_v17 }
 0x331   : > { %v844_v29 = vpop.permute.xlu0 %843  ;;  %v840_v36 = vpop.permute.xlu1 %839  ;;  %v898_v60 = vadd.f32 %v897_v19, %v896_v39 }
 0x332   : > { %v887_v16 = vmul.f32 %v2092_v25, %v844_v29  ;;  %v916_v42 = vrot.slane %v915_v7, 4  ;;  %v886_v14 = vmul.f32 %v2089_v23, %v840_v36  ;;  %v911_v48 = vrot.slane %v910_v32, 2 }
 0x333   : > { %v906_v58 = vrot.slane %v905_v52, 1  ;;  %v899_v0 = vrot.slane %v898_v60, 1 }
 0x334   : > { %v917_v44 = vadd.f32 %v916_v42, %v915_v7  ;;  %v922_v46 = vadd.f32 %v887_v16, %v886_v14  ;;  %v912_v54 = vadd.f32 %v911_v48, %v910_v32 }
 0x335   : > { %v855_v21 = vpop.permute.xlu0 %854  ;;  %v851_v49 = vpop.permute.xlu1 %850  ;;  %v907_v47 = vadd.f32 %v906_v58, %v905_v52  ;;  %v900_v13 = vadd.f32 %v899_v0, %v898_v60 }
 0x336   : > { %v889_v37 = vmul.f32 %v2099_v30, %v855_v21  ;;  %v918_v45 = vrot.slane %v917_v44, 2  ;;  %v923_v27 = vrot.slane %v922_v46, 4  ;;  %v888_v51 = vmul.f32 %v2096_v28, %v851_v49 }
 0x337   : > { %v913_v61 = vrot.slane %v912_v54, 1 }
 0x338   : > { %v924_v25 = vadd.f32 %v923_v27, %v922_v46  ;;  %v929_v55 = vadd.f32 %v889_v37, %v888_v51  ;;  %v919_v41 = vadd.f32 %v918_v45, %v917_v44 }
 0x339   : > { %v866_v53 = vpop.permute.xlu0 %865  ;;  %v862_v56 = vpop.permute.xlu1 %861  ;;  %v914_v10 = vadd.f32 %v913_v61, %v912_v54 }
 0x33a   : > { %v891_v23 = vmul.f32 %v2106_v35, %v866_v53  ;;  %v925_v24 = vrot.slane %v924_v25, 2  ;;  %v930_v57 = vrot.slane %v929_v55, 4  ;;  %v890_v30 = vmul.f32 %v2103_v33, %v862_v56 }
 0x33b   : > { %v920_v31 = vrot.slane %v919_v41, 1  ;;  %v976_v34 = vpack.c.bf16 %v914_v10, %v914_v10 }
 0x33c   : > { %v926_v18 = vadd.f32 %v925_v24, %v924_v25  ;;  %v931_v62 = vadd.f32 %v930_v57, %v929_v55  ;;  %v936_v28 = vadd.f32 %v891_v23, %v890_v30  ;;  %v1408_v30 = vld [vmem:[%s2300_s6] ss:$0 sm:$0xff] }
 0x33d   : > { %v877_v59 = vpop.permute.xlu0 %876  ;;  %v873_v2 = vpop.permute.xlu1 %872  ;;  %v921_v50 = vadd.f32 %v920_v31, %v919_v41  ;;  %v1008_v39 = vunpack.c.l.b16 %v976_v34 }
 0x33e   : > { %v893_v63 = vmul.f32 %v2113_v40, %v877_v59  ;;  %v892_v35 = vmul.f32 %v2110_v38, %v873_v2  ;;  %v927_v1 = vrot.slane %v926_v18, 1  ;;  %v932_v3 = vrot.slane %v931_v62, 2 }
 0x33f   : > { %v937_v4 = vrot.slane %v936_v28, 4  ;;  %v975_v40 = vpack.c.bf16 %v907_v47, %v907_v47  ;;  %v974_v38 = vpack.c.bf16 %v900_v13, %v900_v13  ;;  %v977_v5 = vpack.c.bf16 %v921_v50, %v921_v50 }
 0x340   : > { %v943_v9 = vadd.f32 %v893_v63, %v892_v35  ;;  %v933_v33 = vadd.f32 %v932_v3, %v931_v62  ;;  %v928_v11 = vadd.f32 %v927_v1, %v926_v18 }
 0x341   : > { %v938_v12 = vadd.f32 %v937_v4, %v936_v28  ;;  %v1007_v32 = vunpack.c.l.b16 %v975_v40  ;;  %v1006_v14 = vunpack.c.l.b16 %v974_v38  ;;  %v1009_v43 = vunpack.c.l.b16 %v977_v5 }
 0x342   : > { %v944_v15 = vrot.slane %v943_v9, 4  ;;  %v934_v20 = vrot.slane %v933_v33, 1  ;;  %v978_v7 = vpack.c.bf16 %v928_v11, %v928_v11 }
 0x343   : > { %v939_v22 = vrot.slane %v938_v12, 2  ;;  %v1014_v48 = vsel %vm596_vm1, %v1007_v32, %v1006_v14 }
 0x344   : > { %v945_v8 = vadd.f32 %v944_v15, %v943_v9  ;;  %v935_v26 = vadd.f32 %v934_v20, %v933_v33  ;;  %v1010_v46 = vunpack.c.l.b16 %v978_v7  ;;  %v1015_v19 = vsel %vm598_vm2, %v1008_v39, %v1014_v48 }
 0x345   : > { %v940_v6 = vadd.f32 %v939_v22, %v938_v12  ;;  %v1016_v51 = vsel %vm600_vm3, %v1009_v43, %v1015_v19 }
 0x346   : > { %v946_v17 = vrot.slane %v945_v8, 2  ;;  %v979_v16 = vpack.c.bf16 %v935_v26, %v935_v26  ;;  %v1017_v52 = vsel %vm602_vm4, %v1010_v46, %v1016_v51 }
 0x347   : > { %v941_v29 = vrot.slane %v940_v6, 1 }
 0x348   : > { %v947_v36 = vadd.f32 %v946_v17, %v945_v8  ;;  %v1011_v37 = vunpack.c.l.b16 %v979_v16 }
 0x349   : > { %v942_v42 = vadd.f32 %v941_v29, %v940_v6 }
 0x34a   : > { %v948_v44 = vrot.slane %v947_v36, 1  ;;  %v1018_v53 = vsel %vm604_vm5, %v1011_v37, %v1017_v52 }
 0x34b   : > { %v980_v21 = vpack.c.bf16 %v942_v42, %v942_v42 }
 0x34c   : > { %v949_v49 = vadd.f32 %v948_v44, %v947_v36 }
 0x34d   : > { %v1012_v45 = vunpack.c.l.b16 %v980_v21 }
 0x34e   : > { %v981_v27 = vpack.c.bf16 %v949_v49, %v949_v49 }
 0x34f   : > { %v1019_v54 = vsel %vm606_vm6, %v1012_v45, %v1018_v53 }
 0x350   : > { %v1013_v25 = vunpack.c.l.b16 %v981_v27 }
 0x352   : > { %v1020_v55 = vsel %vm608_vm7, %v1013_v25, %v1019_v54 }
 0x353   : > { %v1021_v23 = vpack.c.b16 %v1020_v55, %v1020_v55 }
 0x355   : > { %1489 = vmatmul.mubr.bf16.vlgmr.msra.gmra.mxu0 %v1021_v23 }
 0x394   : > { %v1218_v56 = vpop.f32.mrf.mxu1 }
 0x396   : > { %v1510_v60 = vpop.f32.mrf.mxu1 }
 0x398   : > { %v1221_v41 = vpop.f32.mrf.mxu1 }
 0x39a   : > { %v1511_v24 = vpop.f32.mrf.mxu1 }
 0x415   : > { %v1105_v57 = vpop.f32.mrf.mxu0 }
 0x416   : > { %v1219_v58 = vadd.f32 %v1218_v56, %v1105_v57 }
 0x417   : > { %v1490_v18 = vpop.f32.mrf.mxu0 }
 0x418   : > { %v1231_v59 = vadd.f32 %v1408_v30, %v1219_v58 }
 0x419   : > { %v1108_v61 = vpop.f32.mrf.mxu0 }
 0x41a   : > { %1607 = vtanh.f32 %v1231_v59 }
 0x41b   : > { %v1491_v62 = vpop.f32.mrf.mxu0 }
 0x427   : > { %v1608_v28 = vpop.eup %1607 }
 0x428   : > { %v1233_v63 = vpack.c.bf16 %v1608_v28, %v1608_v28 }
 0x42a   : > { %1234 = vst [vmem:[%s385_s14] sm:$0xf] %v1233_v63 }
 0x42b   : > { %1732 = shalt.err (!%p1729_p4)
}
 0x42c   : > { %s1733_s11 = scalar_lea.hbm %s1247_s9, 64  ;;  %s1737_s22 = scalar_lea.hbm %s2301_s7, 128 }
 0x42d   : > { %p1734_p12 = scmp.ne.s32.totalorder %s1247_s9, %s1733_s11  ;;  %p1738_p8 = scmp.lt.s32.totalorder %s1247_s9, %s2301_s7 }
 0x42e   : > { %p1739_p6 = scmp.lt.s32.totalorder %s1737_s22, %s1733_s11 }
 0x42f   : > { %p1735_p2 = pnand %p1734_p12, %p2335_p13 }
 0x430   : > { %p1740_p0 = por %p1739_p6, %p1738_p8 }
 0x431   : > { %p1736_p7 = pneg %p1735_p2 }
 0x433   : > { %p1741_p11 = pnand %p1740_p0, %p1736_p7 }
 0x435   : > { %1744 = shalt.err (!%p1741_p11)
}
 0x436   : > { %1522 = dma.vmem_to_hbm [thread:$0]  (%p2335_p13), %s1250_s20, 64, %s1247_s9, %s1236_s10  }
 0x437 PF: > { %s2336_s26 = sld [smem:[#allocation16_spill]] }
 0x438   : > { %s2337_s29 = sld [smem:[#allocation21_spill]] }
 0x439   : > { %s2338_s19 = sld [smem:[#allocation18_spill]] }
 0x43d   : > { %s1261_s8 = sand.u32 1, %s2336_s26  }
 0x43e   : > { %p2339_p1 = scmp.ne.s32.totalorder %s2337_s29, 0  ;;  %s1262_s18 = scalar_lea.sflag [#allocation5], %s1261_s8 }
 0x43f   : > { %p2340_p5 = scmp.ge.s32.totalorder %s2338_s19, 2 }
 0x441   : > { %p1539_p10 = pnand %p2340_p5, %p2339_p1 }
 0x443   : > { %p1540_p9 = pneg %p1539_p10 }
 0x445   : > { %1774 = dma.done.wait (%p1540_p9), %s1262_s18, 64  }
 0x446   : > { %1776 = vsyncadd (%p1540_p9), %s1262_s18, 4294967232  ;;  %s2341_s29 = sld [smem:[#allocation19_spill]]  ;;  %s2344_s26 = smov %s1783_s27 }
 0x447   : > { %s2342_s30 = sld [smem:[#allocation17_spill]] }
 0x448   : > { %s2343_s28 = sld [smem:[#allocation20_spill]] }
 0x44c   : > { %p26_p3 = scmp.ge.s32.totalorder %s2341_s29, 4  }
 0x44d   : > { %s2345_s27 = smov %s2342_s30 }
 0x44e   :  { %28 = sbr.rel (!%p26_p3) target bundleno = 11 (0xb), region = 121 }
 0x453   :  { %1267 = vsyncpa [#allocation4], 1 }
 0x454   :  { %1269 = vsyncpa [#allocation4 + $0x1], 1 }
 0x455   :  { %1270 = vsyncpa [#allocation7], 1 }
 0x456   :  { %1272 = vsyncpa [#allocation7 + $0x1], 1 }
 0x457   :  { %1273 = vsyncpa [#allocation10], 1 }
 0x458   :  { %1274 = vsyncpa [#allocation5], 1 }
 0x459   :  { %1276 = vsyncpa [#allocation5 + $0x1], 1 }

</bundles_post_ra>
